<compile_context>
chip_gen: v6e
topology: v6e:2x2x1
jax: 0.10.0
libtpu: 0.0.40
codegen_flags: <defaults>
</compile_context>

<pallas_src>
import jax
import jax.numpy as jnp
from jax import lax
from jax.experimental import pallas as pl
from jax.experimental.pallas import tpu as pltpu


def _make_block_kernel(H):
    """Kernel closure over the per-image height H (needed for seam masking)."""

    def kernel(x_ref, w1_ref, w2_ref, bn_ref, o_ref):
        # x_ref : (M, L) f32   stacked lane-dense rows of NB whole images
        # w1_ref: (3L, L) bf16 conv1 banded weights (BN1 scale folded in)
        # w2_ref: (3L, L) bf16 conv2 banded weights (BN2 scale folded in)
        # bn_ref: (2, L)  f32  rows: shift1, shift2 (folded BN additive terms)
        # o_ref : (M, L)  f32  output
        M, L = o_ref.shape

        x = x_ref[...]                                        # (M, L) f32

        # Per-image seam masks: after a +/-1 sublane roll over the stacked
        # rows, the first / last row of each image would wrap a row from the
        # neighbouring image -> zero it (== padding=1 zero-pad along H).
        row = lax.broadcasted_iota(jnp.int32, (M, L), 0)
        not_top = (row % H) != 0
        not_bot = (row % H) != (H - 1)

        def shifted_lhs(a):
            # [a[r-1] | a[r] | a[r+1]] with zero rows at image seams.
            a_dn = jnp.where(not_top, pltpu.roll(a, shift=1, axis=0), 0.0)
            a_up = jnp.where(not_bot, pltpu.roll(a, shift=M - 1, axis=0), 0.0)
            return jnp.concatenate([a_dn, a, a_up], axis=-1).astype(jnp.bfloat16)

        # conv1 + bn1 + relu  (one (M,3L)@(3L,L) bf16 MXU matmul, f32 acc)
        h = jnp.maximum(
            jnp.dot(shifted_lhs(x), w1_ref[...],
                    preferred_element_type=jnp.float32) + bn_ref[0:1, :],
            0.0)

        # conv2 + bn2 + residual + relu
        y = jnp.maximum(
            jnp.dot(shifted_lhs(h), w2_ref[...],
                    preferred_element_type=jnp.float32) + bn_ref[1:2, :] + x,
            0.0)

        o_ref[...] = y.astype(o_ref.dtype)

    return kernel


def _band_weights(w_hwio, W):
    """(3,3,Cin,Cout) HWIO weights -> (3, W*Cin, W*Cout) banded per-kh matrices.

    band[kh][(w+kw-1)*Cin + ci, w*Cout + co] = w_hwio[kh, kw, ci, co];
    out-of-range source pixels are absent (== padding=1 zero-pad along W).
    """
    KH, KW, Cin, Cout = w_hwio.shape
    bands = []
    for kh in range(KH):
        m = jnp.zeros((W * Cin, W * Cout), w_hwio.dtype)
        for kw in range(KW):
            shift = jnp.eye(W, W, k=1 - kw, dtype=w_hwio.dtype)
            m = m + jnp.kron(shift, w_hwio[kh, kw])
        bands.append(m)
    return jnp.stack(bands)                                   # (3, W*Cin, W*Cout)


def _fold_bn(gamma, beta, mean, var, eps=1e-5):
    scale = gamma / jnp.sqrt(var + eps)
    shift = beta - mean * scale
    return scale, shift


def basic_block_forward_nhwc(x_nhwc, params):
    """Fused BasicBlock forward. Lane-dense NHWC entry point (no transposes)."""
    N, H, W, C = x_nhwc.shape
    Cout = params["w1_hwio"].shape[-1]
    assert Cout == C, "BasicBlock with downsample=None requires inplanes == planes"
    L = W * C
    # Banded-weight VMEM guard (see TODO above for the W-tiled / K=Cin form).
    assert 2 * (3 * L * L) * 2 < 8 * 1024 * 1024, "banded weights too large; use W-tiled form"

    # Lane-dense stacking: (N, H, W, C) -> (N*H, W*C) is a free row-major reshape.
    x2d = x_nhwc.reshape(N * H, L).astype(jnp.float32)

    # Choose how many whole images per grid step: target M ~= 256 MXU rows.
    NB = 1
    for nb in range(1, N + 1):
        if N % nb == 0 and nb * H <= 256:
            NB = nb
    M = NB * H
    grid = (N // NB,)

    # Fold BN scale into the banded conv weights; precast weights to bf16.
    s1, t1 = _fold_bn(params["bn1_gamma"], params["bn1_beta"],
                      params["bn1_mean"], params["bn1_var"])
    s2, t2 = _fold_bn(params["bn2_gamma"], params["bn2_beta"],
                      params["bn2_mean"], params["bn2_var"])
    w1b = (_band_weights(params["w1_hwio"], W) * jnp.tile(s1, W)[None, None, :])
    w2b = (_band_weights(params["w2_hwio"], W) * jnp.tile(s2, W)[None, None, :])
    w1b = w1b.reshape(3 * L, L).astype(jnp.bfloat16)           # (3L, L)
    w2b = w2b.reshape(3 * L, L).astype(jnp.bfloat16)
    bn = jnp.stack([jnp.tile(t1, W), jnp.tile(t2, W)]).astype(jnp.float32)  # (2, L)

    kernel = _make_block_kernel(H)

    def _call(single_buffer_consts):
        const_kwargs = {}
        if single_buffer_consts:
            # Grid-invariant inputs never re-DMA -> no need to double-buffer.
            const_kwargs = dict(pipeline_mode=pl.Buffered(1))
        w1_spec = pl.BlockSpec((3 * L, L), lambda i: (0, 0), **const_kwargs)
        w2_spec = pl.BlockSpec((3 * L, L), lambda i: (0, 0), **const_kwargs)
        bn_spec = pl.BlockSpec((2, L), lambda i: (0, 0), **const_kwargs)
        return pl.pallas_call(
            kernel,
            out_shape=jax.ShapeDtypeStruct((N * H, L), jnp.float32),
            grid_spec=pltpu.PrefetchScalarGridSpec(
                num_scalar_prefetch=0,
                grid=grid,
                in_specs=[
                    pl.BlockSpec((M, L), lambda i: (i, 0)),
                    w1_spec,
                    w2_spec,
                    bn_spec,
                ],
                out_specs=pl.BlockSpec((M, L), lambda i: (i, 0)),
            ),
            compiler_params=pltpu.CompilerParams(
                dimension_semantics=("parallel",),
            ),
        )(x2d, w1b, w2b, bn)

    try:
        out2d = _call(single_buffer_consts=True)
    except Exception:
        # This jax build does not accept pl.Buffered(1) for the classic
        # pipeline; fall back to default double buffering (extra ~200 KiB VMEM
        # at these shapes, semantics identical).
        out2d = _call(single_buffer_consts=False)

    return out2d.reshape(N, H, W, C).astype(x_nhwc.dtype)


def basic_block_forward(x_nchw, params):
    """PyTorch-interface (NCHW) wrapper around the NHWC fused kernel."""
    x_nhwc = jnp.transpose(x_nchw, (0, 2, 3, 1))
    y = basic_block_forward_nhwc(x_nhwc, params)
    return jnp.transpose(y, (0, 3, 1, 2))


def _reference_forward(x_nchw, params, eps=1e-5):
    # Pure-JAX f32 reference (NHWC lax conv, HIGHEST precision), eval-mode BN.
    x = jnp.transpose(x_nchw, (0, 2, 3, 1))
    dn = ('NHWC', 'HWIO', 'NHWC')

    def conv(a, w):
        return lax.conv_general_dilated(a, w, (1, 1), 'SAME',
                                        dimension_numbers=dn,
                                        precision=lax.Precision.HIGHEST)

    def bn(a, g, b, m, v):
        return (a - m) / jnp.sqrt(v + eps) * g + b

    h = conv(x, params["w1_hwio"])
    h = bn(h, params["bn1_gamma"], params["bn1_beta"],
           params["bn1_mean"], params["bn1_var"])
    h = jnp.maximum(h, 0.0)
    h2 = conv(h, params["w2_hwio"])
    h2 = bn(h2, params["bn2_gamma"], params["bn2_beta"],
            params["bn2_mean"], params["bn2_var"])
    y = jnp.maximum(h2 + x, 0.0)
    return jnp.transpose(y, (0, 3, 1, 2))


if __name__ == "__main__":
    # Small shapes consistent with BasicBlock(inplanes=planes, stride=1).
    # W*C = 128 -> lane-dense activations; stacked MXU M = N*H = 32.
    N, C, H, W = 2, 8, 16, 16
    inplanes = planes = C

    key = jax.random.PRNGKey(0)
    keys = jax.random.split(key, 9)

    # Deterministic synthetic parameters (PyTorch conv weight OIHW -> HWIO).
    w1_oihw = 0.1 * jax.random.normal(keys[0], (planes, inplanes, 3, 3), jnp.float32)
    w2_oihw = 0.1 * jax.random.normal(keys[1], (planes, planes, 3, 3), jnp.float32)
    params = {
        "w1_hwio": jnp.transpose(w1_oihw, (2, 3, 1, 0)),
        "w2_hwio": jnp.transpose(w2_oihw, (2, 3, 1, 0)),
        "bn1_gamma": 1.0 + 0.1 * jax.random.normal(keys[2], (planes,), jnp.float32),
        "bn1_beta": 0.05 * jax.random.normal(keys[3], (planes,), jnp.float32),
        "bn1_mean": 0.02 * jax.random.normal(keys[4], (planes,), jnp.float32),
        "bn1_var": jnp.abs(1.0 + 0.1 * jax.random.normal(keys[5], (planes,), jnp.float32)),
        "bn2_gamma": 1.0 + 0.1 * jax.random.normal(keys[6], (planes,), jnp.float32),
        "bn2_beta": 0.05 * jax.random.normal(keys[7], (planes,), jnp.float32),
        "bn2_mean": jnp.zeros((planes,), jnp.float32),
        "bn2_var": jnp.ones((planes,), jnp.float32),
    }

    x = jax.random.normal(keys[8], (N, C, H, W), jnp.float32)

    out = jax.block_until_ready(basic_block_forward(x, params))
    ref = _reference_forward(x, params)

    assert out.shape == (N, C, H, W)
    max_err = float(jnp.max(jnp.abs(out - ref)))
    # bf16 MXU operands with f32 accumulation -> relaxed tolerance vs f32 ref.
    assert jnp.allclose(out, ref, atol=5e-2, rtol=3e-2), \
        f"mismatch vs reference (max abs err {max_err})"

    print("KERNEL_OK")
</pallas_src>

<mosaic_0001>
module attributes {stable_mosaic.version = 11 : i64} {
  func.func @kernel(%arg0: i32, %arg1: memref<32x128xf32, #tpu.memory_space<vmem>>, %arg2: memref<384x128xbf16, #tpu.memory_space<vmem>>, %arg3: memref<384x128xbf16, #tpu.memory_space<vmem>>, %arg4: memref<2x128xf32, #tpu.memory_space<vmem>>, %arg5: memref<32x128xf32, #tpu.memory_space<vmem>>) attributes {dimension_semantics = [#tpu.dimension_semantics<parallel>], iteration_bounds = array<i64: 1>, scalar_prefetch = 0 : i64, scratch_operands = 0 : i64, tpu.core_type = #tpu.core_type<tc>, window_params = [{transform_indices = @transform_0, window_bounds = array<i64: 32, 128>}, {pipeline_mode = #tpu.pipeline_mode<synchronous>, transform_indices = @transform_1, window_bounds = array<i64: 384, 128>}, {pipeline_mode = #tpu.pipeline_mode<synchronous>, transform_indices = @transform_2, window_bounds = array<i64: 384, 128>}, {pipeline_mode = #tpu.pipeline_mode<synchronous>, transform_indices = @transform_3, window_bounds = array<i64: 2, 128>}, {transform_indices = @transform_4, window_bounds = array<i64: 32, 128>}]} {
    %c0 = arith.constant 0 : index
    %c0_0 = arith.constant 0 : index
    %0 = vector.load %arg1[%c0, %c0_0] : memref<32x128xf32, #tpu.memory_space<vmem>>, vector<32x128xf32>
    %1 = tpu.iota {dimensions = array<i32: 0>} : vector<32x128xi32>
    %c16_i32 = arith.constant 16 : i32
    %c0_i32 = arith.constant 0 : i32
    %2 = arith.cmpi eq, %c16_i32, %c0_i32 : i32
    %c1_i32 = arith.constant 1 : i32
    %3 = arith.select %2, %c1_i32, %c16_i32 : i32
    %4 = vector.broadcast %3 : i32 to vector<32x128xi32>
    %5 = arith.remsi %1, %4 : vector<32x128xi32>
    %c0_i32_1 = arith.constant 0 : i32
    %6 = vector.broadcast %c0_i32_1 : i32 to vector<32x128xi32>
    %7 = arith.cmpi ne, %5, %6 : vector<32x128xi32>
    %c0_i32_2 = arith.constant 0 : i32
    %8 = vector.broadcast %c0_i32_2 : i32 to vector<32x128xi32>
    %9 = arith.cmpi slt, %5, %8 : vector<32x128xi32>
    %c0_i32_3 = arith.constant 0 : i32
    %10 = arith.cmpi slt, %3, %c0_i32_3 : i32
    %11 = vector.broadcast %10 : i1 to vector<32x128xi1>
    %12 = vector.broadcast %11 : vector<32x128xi1> to vector<32x128xi1>
    %13 = arith.xori %9, %12 : vector<32x128xi1>
    %14 = arith.andi %13, %7 : vector<32x128xi1>
    %15 = vector.broadcast %3 : i32 to vector<32x128xi32>
    %16 = arith.addi %5, %15 : vector<32x128xi32>
    %17 = arith.select %14, %16, %5 : vector<32x128xi1>, vector<32x128xi32>
    %c0_i32_4 = arith.constant 0 : i32
    %18 = vector.broadcast %c0_i32_4 : i32 to vector<32x128xi32>
    %19 = arith.cmpi ne, %17, %18 : vector<32x128xi32>
    %c16_i32_5 = arith.constant 16 : i32
    %c0_i32_6 = arith.constant 0 : i32
    %20 = arith.cmpi eq, %c16_i32_5, %c0_i32_6 : i32
    %c1_i32_7 = arith.constant 1 : i32
    %21 = arith.select %20, %c1_i32_7, %c16_i32_5 : i32
    %22 = vector.broadcast %21 : i32 to vector<32x128xi32>
    %23 = arith.remsi %1, %22 : vector<32x128xi32>
    %c0_i32_8 = arith.constant 0 : i32
    %24 = vector.broadcast %c0_i32_8 : i32 to vector<32x128xi32>
    %25 = arith.cmpi ne, %23, %24 : vector<32x128xi32>
    %c0_i32_9 = arith.constant 0 : i32
    %26 = vector.broadcast %c0_i32_9 : i32 to vector<32x128xi32>
    %27 = arith.cmpi slt, %23, %26 : vector<32x128xi32>
    %c0_i32_10 = arith.constant 0 : i32
    %28 = arith.cmpi slt, %21, %c0_i32_10 : i32
    %29 = vector.broadcast %28 : i1 to vector<32x128xi1>
    %30 = vector.broadcast %29 : vector<32x128xi1> to vector<32x128xi1>
    %31 = arith.xori %27, %30 : vector<32x128xi1>
    %32 = arith.andi %31, %25 : vector<32x128xi1>
    %33 = vector.broadcast %21 : i32 to vector<32x128xi32>
    %34 = arith.addi %23, %33 : vector<32x128xi32>
    %35 = arith.select %32, %34, %23 : vector<32x128xi1>, vector<32x128xi32>
    %c15_i32 = arith.constant 15 : i32
    %36 = vector.broadcast %c15_i32 : i32 to vector<32x128xi32>
    %37 = arith.cmpi ne, %35, %36 : vector<32x128xi32>
    %c1_i32_11 = arith.constant 1 : i32
    %38 = tpu.dynamic_rotate %0 by %c1_i32_11 dim 0 : vector<32x128xf32>, i32 -> vector<32x128xf32>
    %cst = arith.constant 0.000000e+00 : f32
    %39 = vector.broadcast %cst : f32 to vector<32x128xf32>
    %40 = arith.select %19, %38, %39 : vector<32x128xi1>, vector<32x128xf32>
    %c31_i32 = arith.constant 31 : i32
    %41 = tpu.dynamic_rotate %0 by %c31_i32 dim 0 : vector<32x128xf32>, i32 -> vector<32x128xf32>
    %cst_12 = arith.constant 0.000000e+00 : f32
    %42 = vector.broadcast %cst_12 : f32 to vector<32x128xf32>
    %43 = arith.select %37, %41, %42 : vector<32x128xi1>, vector<32x128xf32>
    %44 = tpu.concatenate %40, %0, %43 in 1 : vector<32x128xf32>, vector<32x128xf32>, vector<32x128xf32> -> vector<32x384xf32>
    %45 = arith.truncf %44 : vector<32x384xf32> to vector<32x384xbf16>
    %c0_13 = arith.constant 0 : index
    %c0_14 = arith.constant 0 : index
    %46 = vector.load %arg2[%c0_13, %c0_14] : memref<384x128xbf16, #tpu.memory_space<vmem>>, vector<384x128xbf16>
    %cst_15 = arith.constant dense<0.000000e+00> : vector<32x128xf32>
    %47 = tpu.matmul %45, %46, %cst_15 {dimension_numbers = #tpu.dot_dimension_numbers<[1], [0], [0], [1], [0, 0, 1, 1], [], []>} : vector<32x384xbf16>, vector<384x128xbf16>, vector<32x128xf32> -> vector<32x128xf32>
    %c0_16 = arith.constant 0 : index
    %c0_17 = arith.constant 0 : index
    %48 = vector.load %arg4[%c0_16, %c0_17] : memref<2x128xf32, #tpu.memory_space<vmem>>, vector<1x128xf32>
    %49 = vector.broadcast %48 : vector<1x128xf32> to vector<32x128xf32>
    %50 = arith.addf %47, %49 : vector<32x128xf32>
    %cst_18 = arith.constant 0.000000e+00 : f32
    %51 = vector.broadcast %cst_18 : f32 to vector<32x128xf32>
    %52 = arith.maximumf %50, %51 : vector<32x128xf32>
    %c1_i32_19 = arith.constant 1 : i32
    %53 = tpu.dynamic_rotate %52 by %c1_i32_19 dim 0 : vector<32x128xf32>, i32 -> vector<32x128xf32>
    %cst_20 = arith.constant 0.000000e+00 : f32
    %54 = vector.broadcast %cst_20 : f32 to vector<32x128xf32>
    %55 = arith.select %19, %53, %54 : vector<32x128xi1>, vector<32x128xf32>
    %c31_i32_21 = arith.constant 31 : i32
    %56 = tpu.dynamic_rotate %52 by %c31_i32_21 dim 0 : vector<32x128xf32>, i32 -> vector<32x128xf32>
    %cst_22 = arith.constant 0.000000e+00 : f32
    %57 = vector.broadcast %cst_22 : f32 to vector<32x128xf32>
    %58 = arith.select %37, %56, %57 : vector<32x128xi1>, vector<32x128xf32>
    %59 = tpu.concatenate %55, %52, %58 in 1 : vector<32x128xf32>, vector<32x128xf32>, vector<32x128xf32> -> vector<32x384xf32>
    %60 = arith.truncf %59 : vector<32x384xf32> to vector<32x384xbf16>
    %c0_23 = arith.constant 0 : index
    %c0_24 = arith.constant 0 : index
    %61 = vector.load %arg3[%c0_23, %c0_24] : memref<384x128xbf16, #tpu.memory_space<vmem>>, vector<384x128xbf16>
    %cst_25 = arith.constant dense<0.000000e+00> : vector<32x128xf32>
    %62 = tpu.matmul %60, %61, %cst_25 {dimension_numbers = #tpu.dot_dimension_numbers<[1], [0], [0], [1], [0, 0, 1, 1], [], []>} : vector<32x384xbf16>, vector<384x128xbf16>, vector<32x128xf32> -> vector<32x128xf32>
    %c1 = arith.constant 1 : index
    %c0_26 = arith.constant 0 : index
    %63 = vector.load %arg4[%c1, %c0_26] : memref<2x128xf32, #tpu.memory_space<vmem>>, vector<1x128xf32>
    %64 = vector.broadcast %63 : vector<1x128xf32> to vector<32x128xf32>
    %65 = arith.addf %62, %64 : vector<32x128xf32>
    %66 = arith.addf %65, %0 : vector<32x128xf32>
    %cst_27 = arith.constant 0.000000e+00 : f32
    %67 = vector.broadcast %cst_27 : f32 to vector<32x128xf32>
    %68 = arith.maximumf %66, %67 : vector<32x128xf32>
    %c0_28 = arith.constant 0 : index
    %c0_29 = arith.constant 0 : index
    %69 = vector.load %arg5[%c0_28, %c0_29] : memref<32x128xf32, #tpu.memory_space<vmem>>, vector<32x128xf32>
    tpu.vector_store %arg5[%c0_28, %c0_29], %68 {strides = array<i32>} : memref<32x128xf32, #tpu.memory_space<vmem>>, vector<32x128xf32>,
    return
  }
  func.func @transform_0(%arg0: i32) -> (i32, i32) {
    %c0_i32 = arith.constant 0 : i32
    %c0_i32_0 = arith.constant 0 : i32
    return %arg0, %c0_i32 : i32, i32
  }
  func.func @transform_1(%arg0: i32) -> (i32, i32) {
    %c0_i32 = arith.constant 0 : i32
    %c0_i32_0 = arith.constant 0 : i32
    %c0_i32_1 = arith.constant 0 : i32
    return %c0_i32, %c0_i32_0 : i32, i32
  }
  func.func @transform_2(%arg0: i32) -> (i32, i32) {
    %c0_i32 = arith.constant 0 : i32
    %c0_i32_0 = arith.constant 0 : i32
    %c0_i32_1 = arith.constant 0 : i32
    return %c0_i32, %c0_i32_0 : i32, i32
  }
  func.func @transform_3(%arg0: i32) -> (i32, i32) {
    %c0_i32 = arith.constant 0 : i32
    %c0_i32_0 = arith.constant 0 : i32
    %c0_i32_1 = arith.constant 0 : i32
    return %c0_i32, %c0_i32_0 : i32, i32
  }
  func.func @transform_4(%arg0: i32) -> (i32, i32) {
    %c0_i32 = arith.constant 0 : i32
    %c0_i32_0 = arith.constant 0 : i32
    return %arg0, %c0_i32 : i32, i32
  }
}

module attributes {stable_mosaic.version = 11 : i64} {
  func.func @kernel(%arg0: i32, %arg1: memref<32x128xf32, #tpu.memory_space<vmem>>, %arg2: memref<384x128xbf16, #tpu.memory_space<vmem>>, %arg3: memref<384x128xbf16, #tpu.memory_space<vmem>>, %arg4: memref<2x128xf32, #tpu.memory_space<vmem>>, %arg5: memref<32x128xf32, #tpu.memory_space<vmem>>) attributes {dimension_semantics = [#tpu.dimension_semantics<parallel>], iteration_bounds = array<i64: 1>, scalar_prefetch = 0 : i64, scratch_operands = 0 : i64, tpu.core_type = #tpu.core_type<tc>, window_params = [{transform_indices = @transform_0, window_bounds = array<i64: 32, 128>}, {pipeline_mode = #tpu.pipeline_mode<synchronous>, transform_indices = @transform_1, window_bounds = array<i64: 384, 128>}, {pipeline_mode = #tpu.pipeline_mode<synchronous>, transform_indices = @transform_2, window_bounds = array<i64: 384, 128>}, {pipeline_mode = #tpu.pipeline_mode<synchronous>, transform_indices = @transform_3, window_bounds = array<i64: 2, 128>}, {transform_indices = @transform_4, window_bounds = array<i64: 32, 128>}]} {
    %c0 = arith.constant 0 : index
    %c0_0 = arith.constant 0 : index
    %0 = vector.load %arg1[%c0, %c0_0] : memref<32x128xf32, #tpu.memory_space<vmem>>, vector<32x128xf32>
    %1 = tpu.iota {dimensions = array<i32: 0>} : vector<32x128xi32>
    %c16_i32 = arith.constant 16 : i32
    %c0_i32 = arith.constant 0 : i32
    %2 = arith.cmpi eq, %c16_i32, %c0_i32 : i32
    %c1_i32 = arith.constant 1 : i32
    %3 = arith.select %2, %c1_i32, %c16_i32 : i32
    %4 = vector.broadcast %3 : i32 to vector<32x128xi32>
    %5 = arith.remsi %1, %4 : vector<32x128xi32>
    %c0_i32_1 = arith.constant 0 : i32
    %6 = vector.broadcast %c0_i32_1 : i32 to vector<32x128xi32>
    %7 = arith.cmpi ne, %5, %6 : vector<32x128xi32>
    %c0_i32_2 = arith.constant 0 : i32
    %8 = vector.broadcast %c0_i32_2 : i32 to vector<32x128xi32>
    %9 = arith.cmpi slt, %5, %8 : vector<32x128xi32>
    %c0_i32_3 = arith.constant 0 : i32
    %10 = arith.cmpi slt, %3, %c0_i32_3 : i32
    %11 = vector.broadcast %10 : i1 to vector<32x128xi1>
    %12 = vector.broadcast %11 : vector<32x128xi1> to vector<32x128xi1>
    %13 = arith.xori %9, %12 : vector<32x128xi1>
    %14 = arith.andi %13, %7 : vector<32x128xi1>
    %15 = vector.broadcast %3 : i32 to vector<32x128xi32>
    %16 = arith.addi %5, %15 : vector<32x128xi32>
    %17 = arith.select %14, %16, %5 : vector<32x128xi1>, vector<32x128xi32>
    %c0_i32_4 = arith.constant 0 : i32
    %18 = vector.broadcast %c0_i32_4 : i32 to vector<32x128xi32>
    %19 = arith.cmpi ne, %17, %18 : vector<32x128xi32>
    %c16_i32_5 = arith.constant 16 : i32
    %c0_i32_6 = arith.constant 0 : i32
    %20 = arith.cmpi eq, %c16_i32_5, %c0_i32_6 : i32
    %c1_i32_7 = arith.constant 1 : i32
    %21 = arith.select %20, %c1_i32_7, %c16_i32_5 : i32
    %22 = vector.broadcast %21 : i32 to vector<32x128xi32>
    %23 = arith.remsi %1, %22 : vector<32x128xi32>
    %c0_i32_8 = arith.constant 0 : i32
    %24 = vector.broadcast %c0_i32_8 : i32 to vector<32x128xi32>
    %25 = arith.cmpi ne, %23, %24 : vector<32x128xi32>
    %c0_i32_9 = arith.constant 0 : i32
    %26 = vector.broadcast %c0_i32_9 : i32 to vector<32x128xi32>
    %27 = arith.cmpi slt, %23, %26 : vector<32x128xi32>
    %c0_i32_10 = arith.constant 0 : i32
    %28 = arith.cmpi slt, %21, %c0_i32_10 : i32
    %29 = vector.broadcast %28 : i1 to vector<32x128xi1>
    %30 = vector.broadcast %29 : vector<32x128xi1> to vector<32x128xi1>
    %31 = arith.xori %27, %30 : vector<32x128xi1>
    %32 = arith.andi %31, %25 : vector<32x128xi1>
    %33 = vector.broadcast %21 : i32 to vector<32x128xi32>
    %34 = arith.addi %23, %33 : vector<32x128xi32>
    %35 = arith.select %32, %34, %23 : vector<32x128xi1>, vector<32x128xi32>
    %c15_i32 = arith.constant 15 : i32
    %36 = vector.broadcast %c15_i32 : i32 to vector<32x128xi32>
    %37 = arith.cmpi ne, %35, %36 : vector<32x128xi32>
    %c1_i32_11 = arith.constant 1 : i32
    %38 = tpu.dynamic_rotate %0 by %c1_i32_11 dim 0 : vector<32x128xf32>, i32 -> vector<32x128xf32>
    %cst = arith.constant 0.000000e+00 : f32
    %39 = vector.broadcast %cst : f32 to vector<32x128xf32>
    %40 = arith.select %19, %38, %39 : vector<32x128xi1>, vector<32x128xf32>
    %c31_i32 = arith.constant 31 : i32
    %41 = tpu.dynamic_rotate %0 by %c31_i32 dim 0 : vector<32x128xf32>, i32 -> vector<32x128xf32>
    %cst_12 = arith.constant 0.000000e+00 : f32
    %42 = vector.broadcast %cst_12 : f32 to vector<32x128xf32>
    %43 = arith.select %37, %41, %42 : vector<32x128xi1>, vector<32x128xf32>
    %44 = tpu.concatenate %40, %0, %43 in 1 : vector<32x128xf32>, vector<32x128xf32>, vector<32x128xf32> -> vector<32x384xf32>
    %45 = arith.truncf %44 : vector<32x384xf32> to vector<32x384xbf16>
    %c0_13 = arith.constant 0 : index
    %c0_14 = arith.constant 0 : index
    %46 = vector.load %arg2[%c0_13, %c0_14] : memref<384x128xbf16, #tpu.memory_space<vmem>>, vector<384x128xbf16>
    %cst_15 = arith.constant dense<0.000000e+00> : vector<32x128xf32>
    %47 = tpu.matmul %45, %46, %cst_15 {dimension_numbers = #tpu.dot_dimension_numbers<[1], [0], [0], [1], [0, 0, 1, 1], [], []>} : vector<32x384xbf16>, vector<384x128xbf16>, vector<32x128xf32> -> vector<32x128xf32>
    %c0_16 = arith.constant 0 : index
    %c0_17 = arith.constant 0 : index
    %48 = vector.load %arg4[%c0_16, %c0_17] : memref<2x128xf32, #tpu.memory_space<vmem>>, vector<1x128xf32>
    %49 = vector.broadcast %48 : vector<1x128xf32> to vector<32x128xf32>
    %50 = arith.addf %47, %49 : vector<32x128xf32>
    %cst_18 = arith.constant 0.000000e+00 : f32
    %51 = vector.broadcast %cst_18 : f32 to vector<32x128xf32>
    %52 = arith.maximumf %50, %51 : vector<32x128xf32>
    %c1_i32_19 = arith.constant 1 : i32
    %53 = tpu.dynamic_rotate %52 by %c1_i32_19 dim 0 : vector<32x128xf32>, i32 -> vector<32x128xf32>
    %cst_20 = arith.constant 0.000000e+00 : f32
    %54 = vector.broadcast %cst_20 : f32 to vector<32x128xf32>
    %55 = arith.select %19, %53, %54 : vector<32x128xi1>, vector<32x128xf32>
    %c31_i32_21 = arith.constant 31 : i32
    %56 = tpu.dynamic_rotate %52 by %c31_i32_21 dim 0 : vector<32x128xf32>, i32 -> vector<32x128xf32>
    %cst_22 = arith.constant 0.000000e+00 : f32
    %57 = vector.broadcast %cst_22 : f32 to vector<32x128xf32>
    %58 = arith.select %37, %56, %57 : vector<32x128xi1>, vector<32x128xf32>
    %59 = tpu.concatenate %55, %52, %58 in 1 : vector<32x128xf32>, vector<32x128xf32>, vector<32x128xf32> -> vector<32x384xf32>
    %60 = arith.truncf %59 : vector<32x384xf32> to vector<32x384xbf16>
    %c0_23 = arith.constant 0 : index
    %c0_24 = arith.constant 0 : index
    %61 = vector.load %arg3[%c0_23, %c0_24] : memref<384x128xbf16, #tpu.memory_space<vmem>>, vector<384x128xbf16>
    %cst_25 = arith.constant dense<0.000000e+00> : vector<32x128xf32>
    %62 = tpu.matmul %60, %61, %cst_25 {dimension_numbers = #tpu.dot_dimension_numbers<[1], [0], [0], [1], [0, 0, 1, 1], [], []>} : vector<32x384xbf16>, vector<384x128xbf16>, vector<32x128xf32> -> vector<32x128xf32>
    %c1 = arith.constant 1 : index
    %c0_26 = arith.constant 0 : index
    %63 = vector.load %arg4[%c1, %c0_26] : memref<2x128xf32, #tpu.memory_space<vmem>>, vector<1x128xf32>
    %64 = vector.broadcast %63 : vector<1x128xf32> to vector<32x128xf32>
    %65 = arith.addf %62, %64 : vector<32x128xf32>
    %66 = arith.addf %65, %0 : vector<32x128xf32>
    %cst_27 = arith.constant 0.000000e+00 : f32
    %67 = vector.broadcast %cst_27 : f32 to vector<32x128xf32>
    %68 = arith.maximumf %66, %67 : vector<32x128xf32>
    %c0_28 = arith.constant 0 : index
    %c0_29 = arith.constant 0 : index
    %69 = vector.load %arg5[%c0_28, %c0_29] : memref<32x128xf32, #tpu.memory_space<vmem>>, vector<32x128xf32>
    tpu.vector_store %arg5[%c0_28, %c0_29], %68 {strides = array<i32>} : memref<32x128xf32, #tpu.memory_space<vmem>>, vector<32x128xf32>,
    return
  }
  func.func @transform_0(%arg0: i32) -> (i32, i32) {
    %c0_i32 = arith.constant 0 : i32
    %c0_i32_0 = arith.constant 0 : i32
    return %arg0, %c0_i32 : i32, i32
  }
  func.func @transform_1(%arg0: i32) -> (i32, i32) {
    %c0_i32 = arith.constant 0 : i32
    %c0_i32_0 = arith.constant 0 : i32
    %c0_i32_1 = arith.constant 0 : i32
    return %c0_i32, %c0_i32_0 : i32, i32
  }
  func.func @transform_2(%arg0: i32) -> (i32, i32) {
    %c0_i32 = arith.constant 0 : i32
    %c0_i32_0 = arith.constant 0 : i32
    %c0_i32_1 = arith.constant 0 : i32
    return %c0_i32, %c0_i32_0 : i32, i32
  }
  func.func @transform_3(%arg0: i32) -> (i32, i32) {
    %c0_i32 = arith.constant 0 : i32
    %c0_i32_0 = arith.constant 0 : i32
    %c0_i32_1 = arith.constant 0 : i32
    return %c0_i32, %c0_i32_0 : i32, i32
  }
  func.func @transform_4(%arg0: i32) -> (i32, i32) {
    %c0_i32 = arith.constant 0 : i32
    %c0_i32_0 = arith.constant 0 : i32
    return %arg0, %c0_i32 : i32, i32
  }
}

</mosaic_0001>

<bundles_post_ra>
// kernel: tpu_custom_call.1
= control target key start
LH: loop header
LB: loop body
LE: loop exit
PB: predicated region body
PF: predicated region fallthrough
CT: control target
= control target key end

     0   :  { %9 = vsyncpa [#allocation3], 0  ;;  %s1320_s0 = inlined_call_operand.hbm [shape: f32[32,128], index: 0, kind: input, shape index: {}]   ;;  %s1321_s1 = inlined_call_operand.hbm [shape: bf16[384,128], index: 1, kind: input, shape index: {}]   ;;  %s1322_s2 = inlined_call_operand.hbm [shape: bf16[384,128], index: 2, kind: input, shape index: {}]   ;;  %s1323_s3 = inlined_call_operand.vmem [shape: f32[2,128], index: 3, kind: input, shape index: {}]   ;;  %s1324_s4 = inlined_call_operand.hbm [shape: f32[32,128], index: 4, kind: output, shape index: {}]  }
   0x1   :  { %10 = vsyncpa [#allocation6], 0 }
   0x2   :  { %11 = vsyncpa [#allocation4], 0  ;;  %s1144_s15 = smov [#allocation5]  }
   0x3   :  { %s29_s16 = sshll.u32 %s1144_s15, 4  ;;  %s30_s16 = int_to_ptr.vmem [resolvable:$true] %s29_s16 }
   0x4   :  { %s1066_s17 = scalar_lea.vmem %s30_s16, 3072  ;;  %p1071_p1 = scmp.lt.s32.totalorder %s30_s16, %s30_s16 }
   0x5   :  { %p1067_p0 = scmp.ne.s32.totalorder %s30_s16, %s1066_s17  ;;  %p1072_p2 = scmp.lt.s32.totalorder %s1066_s17, %s1066_s17 }
   0x7   :  { %p1073_p3 = por %p1072_p2, %p1071_p1 }
   0x9   :  { %p1074_p4 = pnand %p1073_p3, %p1067_p0 }
   0xb   :  { %1077 = shalt.err (!%p1074_p4)
}
   0xc   :  { %s1145_s18 = smov 64   ;;  %s1146_s19 = smov 4  }
   0xd   :  { %35 = dma.hbm_to_vmem [thread:$0]  %s1321_s1, 3072, %s30_s16, [#allocation6], %s1145_s18, %s1145_s18, %s1146_s19  }
   0xe   :  { %s1147_s22 = smov [#allocation2]  }
   0xf   :  { %s17_s23 = sshll.u32 %s1147_s22, 4  ;;  %s18_s23 = int_to_ptr.vmem [resolvable:$true] %s17_s23 }
  0x10   :  { %s1086_s24 = scalar_lea.vmem %s18_s23, 512  ;;  %p1091_p6 = scmp.lt.s32.totalorder %s18_s23, %s18_s23 }
  0x11   :  { %p1087_p5 = scmp.ne.s32.totalorder %s18_s23, %s1086_s24  ;;  %p1092_p7 = scmp.lt.s32.totalorder %s1086_s24, %s1086_s24 }
  0x13   :  { %p1093_p8 = por %p1092_p7, %p1091_p6 }
  0x15   :  { %p1094_p9 = pnand %p1093_p8, %p1087_p5 }
  0x17   :  { %1097 = shalt.err (!%p1094_p9)
}
  0x18   :  { %s1148_s25 = smov 128   ;;  %s1149_s26 = smov 8  }
  0x19   :  { %23 = dma.hbm_to_vmem [thread:$0]  %s1320_s0, 512, %s18_s23, [#allocation3], %s1148_s25, %s1148_s25, %s1149_s26  }
  0x1a   :  { %s1150_s1 = smov [#allocation7]  }
  0x1b   :  { %s41_s29 = sshll.u32 %s1150_s1, 4  ;;  %s42_s29 = int_to_ptr.vmem [resolvable:$true] %s41_s29 }
  0x1c   :  { %s1106_s30 = scalar_lea.vmem %s42_s29, 3072  ;;  %p1111_p11 = scmp.lt.s32.totalorder %s42_s29, %s42_s29 }
  0x1d   :  { %p1107_p10 = scmp.ne.s32.totalorder %s42_s29, %s1106_s30  ;;  %p1112_p12 = scmp.lt.s32.totalorder %s1106_s30, %s1106_s30 }
  0x1f   :  { %p1113_p13 = por %p1112_p12, %p1111_p11 }
  0x21   :  { %p1114_p0 = pnand %p1113_p13, %p1107_p10 }
  0x23   :  { %1117 = shalt.err (!%p1114_p0)
}
  0x24   :  { %47 = dma.hbm_to_vmem [thread:$0]  %s1322_s2, 3072, %s42_s29, [#allocation6], %s1145_s18, %s1145_s18, %s1146_s19  }
  0x25   :  { %1138 = dma.done.wait [#allocation3], 512  }
  0x26   :  { %1139 = vsyncadd [#allocation3], 4294966784 }
  0x27   :  { %1140 = dma.done.wait [#allocation6], 6144  }
  0x28   :  { %1141 = vsyncadd [#allocation6], 4294961152  ;;  %v1010_v0 = vld [vmem:[#allocation5 + $0x78] sm:$0xff]   ;;  %v1012_v2 = vld [vmem:[#allocation5 + $0x70] sm:$0xff]   ;;  %v64_v7 = vlaneseq  ;;  %vm1151_vm5 = vmmov 1  }
  0x29   :  { %v1011_v1 = vld [vmem:[#allocation5 + $0x38] sm:$0xff]   ;;  %885 = vmatprep.subr.bf16.mxu0 %v1010_v0  ;;  %v1014_v4 = vld [vmem:[#allocation5 + $0x30] sm:$0xff]   ;;  %v1015_v5 = vld [vmem:[#allocation5 + $0x68] sm:$0xff]  }
  0x2a   :  { %886 = vmatpush3.bf16.msra.mxu0 %v1011_v1  ;;  %v1013_v3 = vld [vmem:[#allocation5 + $0xb8] sm:$0xff]   ;;  %v1016_v6 = vld [vmem:[#allocation5 + $0xb0] sm:$0xff]   ;;  %v1017_v8 = vld [vmem:[#allocation5 + $0x28] sm:$0xff]   ;;  %v1190_v12 = vshrl.u32 %v64_v7, 7 }
  0x2b   :  { %887 = vmatprep.subr.bf16.mxu0 %v1012_v2  ;;  %961 = vmatprep.subr.bf16.mxu1 %v1013_v3  ;;  %v1018_v9 = vld [vmem:[#allocation5 + $0x60] sm:$0xff]   ;;  %v1019_v10 = vld [vmem:[#allocation5 + $0xa8] sm:$0xff]   ;;  %v1021_v13 = vld [vmem:[#allocation5 + $0x58] sm:$0xff]  }
  0x2c   :  { %962 = vmatpush3.bf16.msra.mxu1 %v1013_v3  ;;  %v1020_v11 = vld [vmem:[#allocation5 + $0x20] sm:$0xff]   ;;  %v1023_v15 = vld [vmem:[#allocation5 + $0x18] sm:$0xff]   ;;  %v66_v16 = vadd.s32 8, %v1190_v12  ;;  %v68_v18 = vadd.s32 24, %v1190_v12  ;;  %v1024_v19 = vld [vmem:[#allocation5 + $0x50] sm:$0xff]   ;;  %v73_v20 = vand.u32 15, %v1190_v12 }
  0x2d   :  { %963 = vmatprep.subr.bf16.mxu1 %v1016_v6  ;;  %v1022_v14 = vld [vmem:[#allocation5 + $0xa0] sm:$0xff]   ;;  %v1025_v17 = vld [vmem:[#allocation5 + $0x98] sm:$0xff]   ;;  %v67_v21 = vadd.s32 16, %v1190_v12  ;;  %v1026_v22 = vld [vmem:[#allocation5 + $0x10] sm:$0xff]   ;;  %vm129_vm0 = vcmp.lt.s32.totalorder %v1190_v12, 1  ;;  %vm142_vm1 = vcmp.lt.s32.totalorder %v1190_v12, 7 }
  0x2e   :  { %888 = vmatpush3.bf16.msra.mxu0 %v1014_v4  ;;  %v80_v23 = vand.u32 15, %v66_v16  ;;  %v1028_v24 = vld [vmem:[#allocation5 + $0x90] sm:$0xff]   ;;  %v94_v25 = vand.u32 15, %v68_v18  ;;  %v1027_v26 = vld [vmem:[#allocation5 + $0x48] sm:$0xff]   ;;  %vm1198_vm2 = vcmp.ne.s32.totalorder %v73_v20, 0  ;;  %v1202_v30 = vld [vmem:[#allocation2] sm:$0xff] }
  0x2f   :  { %889 = vmatprep.subr.bf16.mxu0 %v1015_v5  ;;  %v1029_v27 = vld [vmem:[#allocation5 + $0x8] sm:$0xff]   ;;  %v1206_v32 = vld [vmem:[#allocation2 + $0x18] sm:$0xff]  ;;  %v87_v35 = vand.u32 15, %v67_v21  ;;  %v1030_v36 = vld [vmem:[#allocation5 + $0x40] sm:$0xff]   ;;  %v125_v37 = vrot.slane %v1202_v30, 7  ;;  %v138_v44 = vrot.slane %v1202_v30, 1 }
  0x30   :  { %964 = vmatpush3.bf16.msra.mxu1 %v1016_v6  ;;  %v1031_v28 = vld [vmem:[#allocation5 + $0x88] sm:$0xff]   ;;  %vm1208_vm3 = vcmp.ne.s32.totalorder %v80_v23, 15  ;;  %vm1212_vm4 = vcmp.ne.s32.totalorder %v94_v25, 15  ;;  %v128_v40 = vrot.slane %v1206_v32, 7  ;;  %v1032_v41 = vld [vmem:[#allocation5] sm:$0xff]   ;;  %vm1224_vm6 = vmpackc.low %vm1151_vm5, %vm1198_vm2  ;;  %v141_v48 = vrot.slane %v1206_v32, 1 }
  0x31   :  { %965 = vmatprep.subr.bf16.mxu1 %v1019_v10  ;;  %v1204_v31 = vld [vmem:[#allocation2 + $0x8] sm:$0xff]  ;;  %v1228_v43 = vld [vmem:[#allocation2 + $0x10] sm:$0xff]  ;;  %vm1236_vm7 = vmpackc.low %vm1208_vm3, %vm1151_vm5  ;;  %vm119_vm9 = vcmp.ne.s32.totalorder %v87_v35, 0 }
  0x32   :  { %890 = vmatpush3.bf16.msra.mxu0 %v1017_v8  ;;  %v126_v38 = vrot.slane %v1204_v31, 7  ;;  %v152_v39 = vpack.c.bf16 %v1204_v31, %v1202_v30  ;;  %v139_v45 = vrot.slane %v1204_v31, 1  ;;  %v140_v46 = vrot.slane %v1228_v43, 1  ;;  %v1033_v51 = vld [vmem:[#allocation5 + $0x80] sm:$0xff]   ;;  %vm1250_vm8 = vmpackc.low %vm1212_vm4, %vm1151_vm5  ;;  %v1034_v55 = vld [vmem:[#allocation7 + $0x78] sm:$0xff]  }
  0x33   :  { %891 = vmatprep.subr.bf16.mxu0 %v1018_v9  ;;  %v133_v50 = vsel %vm129_vm0, %v128_v40, %v125_v37  ;;  %v127_v57 = vrot.slane %v1228_v43, 7  ;;  %v1035_v58 = vld [vmem:[#allocation7 + $0xb8] sm:$0xff]   ;;  %v146_v61 = vsel %vm142_vm1, %v141_v48, %v138_v44  ;;  %v155_v63 = vpack.c.bf16 %v1206_v32, %v1228_v43  ;;  %vm1264_vm10 = vmpackc.low %vm1151_vm5, %vm119_vm9  ;;  %v1037_v5 = vld [vmem:[#allocation7 + $0x70] sm:$0xff]  }
  0x34   :  { %966 = vmatpush3.bf16.msra.mxu1 %v1019_v10  ;;  %386 = vmatprep.mubr.bf16.mxu0 %v152_v39  ;;  %v132_v49 = vsel %vm129_vm0, %v125_v37, %v126_v38  ;;  %v145_v52 = vsel %vm142_vm1, %v138_v44, %v139_v45  ;;  %v144_v54 = vsel %vm142_vm1, %v139_v45, %v140_v46  ;;  %v1036_v62 = vld [vmem:[#allocation7 + $0x38] sm:$0xff]   ;;  %v1038_v6 = vld [vmem:[#allocation7 + $0xb0] sm:$0xff]   ;;  %v1040_v8 = vld [vmem:[#allocation7 + $0x68] sm:$0xff]  }
  0x35   :  { %967 = vmatprep.subr.bf16.mxu1 %v1022_v14  ;;  %v843_v56 = vpack.c.bf16 %v144_v54, %v145_v52  ;;  %v837_v59 = vpack.c.bf16 %v132_v49, %v133_v50  ;;  %v143_v60 = vsel %vm142_vm1, %v140_v46, %v141_v48  ;;  %v130_v2 = vsel %vm129_vm0, %v127_v57, %v128_v40  ;;  %v1039_v7 = vld [vmem:[#allocation7 + $0x30] sm:$0xff]   ;;  %v1041_v9 = vld [vmem:[#allocation7 + $0xa8] sm:$0xff]   ;;  %v1047_v16 = vld [vmem:[#allocation7 + $0x98] sm:$0xff]  }
  0x36   :  { %892 = vmatpush3.bf16.msra.mxu0 %v1020_v11  ;;  %v846_v1 = vpack.c.bf16 %v146_v61, %v143_v60  ;;  %v131_v3 = vsel %vm129_vm0, %v126_v38, %v127_v57  ;;  %v1042_v10 = vld [vmem:[#allocation7 + $0x28] sm:$0xff]   ;;  %v1043_v11 = vld [vmem:[#allocation7 + $0x60] sm:$0xff]   ;;  %v1049_v18 = vld [vmem:[#allocation7 + $0x50] sm:$0xff]  }
  0x37   :  { %893 = vmatprep.subr.bf16.mxu0 %v1021_v13  ;;  %977 = vmatprep.mubr.msk.bf16.mxu1 %vm1236_vm7, %v843_v56  ;;  %v840_v4 = vpack.c.bf16 %v130_v2, %v131_v3  ;;  %v1044_v13 = vld [vmem:[#allocation7 + $0xa0] sm:$0xff]   ;;  %v1051_v20 = vld [vmem:[#allocation7 + $0x10] sm:$0xff]   ;;  %v1052_v21 = vld [vmem:[#allocation7 + $0x48] sm:$0xff]  }
  0x38   :  { %968 = vmatpush3.bf16.msra.mxu1 %v1022_v14  ;;  %v1045_v14 = vld [vmem:[#allocation7 + $0x20] sm:$0xff]   ;;  %v1054_v23 = vld [vmem:[#allocation7 + $0x8] sm:$0xff]  }
  0x39   :  { %969 = vmatprep.subr.bf16.mxu1 %v1025_v17  ;;  %v1056_v25 = vld [vmem:[#allocation7 + $0x80] sm:$0xff]  }
  0x3a   :  { %894 = vmatpush3.bf16.msra.mxu0 %v1023_v15  ;;  %v1046_v15 = vld [vmem:[#allocation7 + $0x58] sm:$0xff]   ;;  %v811_v34 = vld [vmem:[%s1323_s3] ss:$0 sm:$0xff]  ;;  %v848_v42 = vld [vmem:[%s1323_s3 + $0x1] ss:$0 sm:$0xff]  ;;  %s1152_s3 = smov [#allocation8]  }
  0x3b   :  { %895 = vmatprep.subr.bf16.mxu0 %v1024_v19  ;;  %v1050_v19 = vld [vmem:[#allocation7 + $0x90] sm:$0xff]   ;;  %s798_s9 = sshll.u32 %s1152_s3, 4  ;;  %s799_s9 = int_to_ptr.vmem [resolvable:$true] %s798_s9 }
  0x3c   :  { %970 = vmatpush3.bf16.msra.mxu1 %v1025_v17  ;;  %v1048_v17 = vld [vmem:[#allocation7 + $0x18] sm:$0xff]   ;;  %s1118_s10 = scalar_lea.vmem %s799_s9, 512  ;;  %p1123_p2 = scmp.lt.s32.totalorder %s799_s9, %s799_s9 }
  0x3d   :  { %971 = vmatprep.subr.bf16.mxu1 %v1028_v24  ;;  %p1119_p1 = scmp.ne.s32.totalorder %s799_s9, %s1118_s10  ;;  %p1124_p3 = scmp.lt.s32.totalorder %s1118_s10, %s1118_s10 }
  0x3e   :  { %896 = vmatpush3.bf16.msra.mxu0 %v1026_v22  ;;  %v1053_v22 = vld [vmem:[#allocation7 + $0x88] sm:$0xff]  }
  0x3f   :  { %897 = vmatprep.subr.bf16.mxu0 %v1027_v26  ;;  %v1057_v26 = vld [vmem:[#allocation7] sm:$0xff]   ;;  %p1125_p4 = por %p1124_p3, %p1123_p2 }
  0x40   :  { %972 = vmatpush3.bf16.msra.mxu1 %v1028_v24  ;;  %v1055_v24 = vld [vmem:[#allocation7 + $0x40] sm:$0xff]  }
  0x41   :  { %973 = vmatprep.subr.bf16.mxu1 %v1031_v28  ;;  %p1126_p5 = pnand %p1125_p4, %p1119_p1 }
  0x42   :  { %898 = vmatpush3.bf16.msra.mxu0 %v1029_v27 }
  0x43   :  { %899 = vmatprep.subr.bf16.mxu0 %v1030_v36 }
  0x44   :  { %974 = vmatpush3.bf16.msra.mxu1 %v1031_v28 }
  0x45   :  { %975 = vmatprep.subr.bf16.mxu1 %v1033_v51 }
  0x46   :  { %900 = vmatpush3.bf16.msra.mxu0 %v1032_v41 }
  0x47   :  { %923 = vmatprep.subr.bf16.mxu0 %v1034_v55 }
  0x48   :  { %976 = vmatpush3.bf16.msra.mxu1 %v1033_v51 }
  0x49   :  { %838 = vmatmul.mubr.msk.bf16.vlgmr.msra.gmra.mxu0 %vm1224_vm6, %v837_v59  ;;  %981 = vmatprep.subr.bf16.mxu1 %v1035_v58 }
  0x4a   :  { %394 = vmatprep.mubr.bf16.mxu0 %v155_v63  ;;  %924 = vmatpush3.bf16.msra.mxu0 %v1036_v62 }
  0x4b   :  { %978 = vmatmul.mubr.msk.bf16.vlgmr.msra.gmra.mxu1 %vm1250_vm8, %v846_v1  ;;  %925 = vmatprep.subr.bf16.mxu0 %v1037_v5 }
  0x4c   :  { %982 = vmatpush3.bf16.msra.mxu1 %v1035_v58 }
  0x4d   :  { %983 = vmatprep.subr.bf16.mxu1 %v1038_v6 }
  0x4e   :  { %926 = vmatpush3.bf16.msra.mxu0 %v1039_v7 }
  0x4f   :  { %927 = vmatprep.subr.bf16.mxu0 %v1040_v8 }
  0x50   :  { %984 = vmatpush3.bf16.msra.mxu1 %v1038_v6 }
  0x51   :  { %841 = vmatmul.mubr.msk.bf16.gmra.mxu0 %vm1264_vm10, %v840_v4  ;;  %985 = vmatprep.subr.bf16.mxu1 %v1041_v9 }
  0x52   :  { %928 = vmatpush3.bf16.msra.mxu0 %v1042_v10 }
  0x53   :  { %929 = vmatprep.subr.bf16.mxu0 %v1043_v11 }
  0x54   :  { %986 = vmatpush3.bf16.msra.mxu1 %v1041_v9 }
  0x55   :  { %987 = vmatprep.subr.bf16.mxu1 %v1044_v13 }
  0x56   :  { %930 = vmatpush3.bf16.msra.mxu0 %v1045_v14 }
  0x57   :  { %931 = vmatprep.subr.bf16.mxu0 %v1046_v15 }
  0x58   :  { %988 = vmatpush3.bf16.msra.mxu1 %v1044_v13 }
  0x59   :  { %989 = vmatprep.subr.bf16.mxu1 %v1047_v16 }
  0x5a   :  { %932 = vmatpush3.bf16.msra.mxu0 %v1048_v17 }
  0x5b   :  { %933 = vmatprep.subr.bf16.mxu0 %v1049_v18 }
  0x5c   :  { %990 = vmatpush3.bf16.msra.mxu1 %v1047_v16 }
  0x5d   :  { %991 = vmatprep.subr.bf16.mxu1 %v1050_v19 }
  0x5e   :  { %934 = vmatpush3.bf16.msra.mxu0 %v1051_v20 }
  0x5f   :  { %935 = vmatprep.subr.bf16.mxu0 %v1052_v21 }
  0x60   :  { %992 = vmatpush3.bf16.msra.mxu1 %v1050_v19 }
  0x61   :  { %993 = vmatprep.subr.bf16.mxu1 %v1053_v22 }
  0x62   :  { %936 = vmatpush3.bf16.msra.mxu0 %v1054_v23 }
  0x63   :  { %937 = vmatprep.subr.bf16.mxu0 %v1055_v24 }
  0x64   :  { %994 = vmatpush3.bf16.msra.mxu1 %v1053_v22 }
  0x65   :  { %995 = vmatprep.subr.bf16.mxu1 %v1056_v25 }
  0x66   :  { %938 = vmatpush3.bf16.msra.mxu0 %v1057_v26 }
  0x68   :  { %996 = vmatpush3.bf16.msra.mxu1 %v1056_v25 }
 0x109   :  { %v901_v27 = vpop.f32.mrf.mxu0 }
 0x10b   :  { %v902_v28 = vpop.f32.mrf.mxu0  ;;  %v979_v33 = vpop.f32.mrf.mxu1 }
 0x10c   :  { %v903_v29 = vadd.f32 %v902_v28, %v901_v27 }
 0x10d   :  { %v904_v35 = vpop.f32.mrf.mxu0  ;;  %v437_v36 = vpop.f32.mrf.mxu1 }
 0x10e   :  { %v389_v38 = vadd.f32 %v903_v29, %v811_v34 }
 0x10f   :  { %v905_v37 = vpop.f32.mrf.mxu0  ;;  %v980_v40 = vpop.f32.mrf.mxu1 }
 0x110   :  { %v906_v39 = vadd.f32 %v905_v37, %v904_v35  ;;  %v438_v46 = vadd.f32 %v437_v36, %v389_v38 }
 0x111   :  { %v907_v41 = vpop.f32.mrf.mxu0  ;;  %v440_v45 = vpop.f32.mrf.mxu1 }
 0x112   :  { %v392_v44 = vadd.f32 %v906_v39, %v811_v34  ;;  %v452_v55 = vmax.f32 %v438_v46, 0.0 }
 0x113   :  { %v908_v48 = vpop.f32.mrf.mxu0 }
 0x114   :  { %v909_v49 = vadd.f32 %v908_v48, %v907_v41  ;;  %v441_v50 = vadd.f32 %v440_v45, %v392_v44  ;;  %v468_v63 = vrot.slane %v452_v55, 1  ;;  %v456_v8 = vrot.slane %v452_v55, 7 }
 0x115   :  { %v910_v51 = vpop.f32.mrf.mxu0 }
 0x116   :  { %v397_v52 = vadd.f32 %v909_v49, %v811_v34  ;;  %v453_v54 = vmax.f32 %v441_v50, 0.0 }
 0x117   :  { %v911_v56 = vpop.f32.mrf.mxu0 }
 0x118   :  { %v446_v57 = vadd.f32 %v979_v33, %v397_v52  ;;  %v912_v58 = vadd.f32 %v911_v56, %v910_v51  ;;  %v481_v59 = vpack.c.bf16 %v453_v54, %v452_v55  ;;  %v469_v61 = vrot.slane %v453_v54, 1 }
 0x119   :  { %v457_v3 = vrot.slane %v453_v54, 7 }
 0x11a   :  { %v454_v60 = vmax.f32 %v446_v57, 0.0  ;;  %v400_v62 = vadd.f32 %v912_v58, %v811_v34  ;;  %715 = vmatprep.mubr.bf16.mxu0 %v481_v59  ;;  %v474_v6 = vsel %vm142_vm1, %v468_v63, %v469_v61 }
 0x11b   :  { %v462_v11 = vsel %vm129_vm0, %v456_v8, %v457_v3 }
 0x11c   :  { %v470_v1 = vrot.slane %v454_v60, 1  ;;  %v449_v2 = vadd.f32 %v980_v40, %v400_v62  ;;  %v458_v47 = vrot.slane %v454_v60, 7 }
 0x11e   :  { %v455_v4 = vmax.f32 %v449_v2, 0.0  ;;  %v473_v5 = vsel %vm142_vm1, %v469_v61, %v470_v1  ;;  %v461_v20 = vsel %vm129_vm0, %v457_v3, %v458_v47 }
 0x11f   :  { %v880_v7 = vpack.c.bf16 %v473_v5, %v474_v6 }
 0x120   :  { %v459_v9 = vrot.slane %v455_v4, 7  ;;  %v471_v10 = vrot.slane %v455_v4, 1  ;;  %v484_v18 = vpack.c.bf16 %v455_v4, %v454_v60 }
 0x121   :  { %997 = vmatprep.mubr.msk.bf16.mxu1 %vm1236_vm7, %v880_v7 }
 0x122   :  { %v463_v13 = vsel %vm129_vm0, %v459_v9, %v456_v8  ;;  %v472_v14 = vsel %vm142_vm1, %v470_v1, %v471_v10  ;;  %v475_v15 = vsel %vm142_vm1, %v471_v10, %v468_v63  ;;  %v460_v19 = vsel %vm129_vm0, %v458_v47, %v459_v9 }
 0x123   :  { %v874_v16 = vpack.c.bf16 %v462_v11, %v463_v13  ;;  %v883_v17 = vpack.c.bf16 %v475_v15, %v472_v14  ;;  %v877_v21 = vpack.c.bf16 %v460_v19, %v461_v20 }
 0x125   :  { %875 = vmatmul.mubr.msk.bf16.vlgmr.msra.gmra.mxu0 %vm1224_vm6, %v874_v16  ;;  %998 = vmatmul.mubr.msk.bf16.vlgmr.msra.gmra.mxu1 %vm1250_vm8, %v883_v17 }
 0x126   :  { %723 = vmatprep.mubr.bf16.mxu0 %v484_v18 }
 0x12d   :  { %878 = vmatmul.mubr.msk.bf16.gmra.mxu0 %vm1264_vm10, %v877_v21 }
 0x1e5   :  { %v939_v22 = vpop.f32.mrf.mxu0  ;;  %v999_v23 = vpop.f32.mrf.mxu1 }
 0x1e7   :  { %v940_v24 = vpop.f32.mrf.mxu0  ;;  %v766_v53 = vpop.f32.mrf.mxu1 }
 0x1e8   :  { %v941_v25 = vadd.f32 %v940_v24, %v939_v22 }
 0x1e9   :  { %v942_v26 = vpop.f32.mrf.mxu0  ;;  %v1000_v28 = vpop.f32.mrf.mxu1 }
 0x1ea   :  { %v718_v27 = vadd.f32 %v941_v25, %v848_v42 }
 0x1eb   :  { %v943_v29 = vpop.f32.mrf.mxu0  ;;  %v769_v36 = vpop.f32.mrf.mxu1 }
 0x1ec   :  { %v767_v33 = vadd.f32 %v766_v53, %v718_v27  ;;  %v944_v12 = vadd.f32 %v943_v29, %v942_v26 }
 0x1ed   :  { %v945_v34 = vpop.f32.mrf.mxu0 }
 0x1ee   :  { %v781_v35 = vadd.f32 %v767_v33, %v1202_v30  ;;  %v721_v0 = vadd.f32 %v944_v12, %v848_v42 }
 0x1ef   :  { %v946_v37 = vpop.f32.mrf.mxu0 }
 0x1f0   :  { %v785_v38 = vmax.f32 %v781_v35, 0.0  ;;  %v770_v39 = vadd.f32 %v769_v36, %v721_v0  ;;  %v947_v40 = vadd.f32 %v946_v37, %v945_v34 }
 0x1f1   :  { %v948_v41 = vpop.f32.mrf.mxu0 }
 0x1f2   :  { %789 = vst [vmem:[#allocation8] sm:$0xff] %v785_v38  ;;  %v782_v44 = vadd.f32 %v770_v39, %v1204_v31  ;;  %v726_v45 = vadd.f32 %v947_v40, %v848_v42 }
 0x1f3   :  { %v949_v46 = vpop.f32.mrf.mxu0 }
 0x1f4   :  { %v786_v48 = vmax.f32 %v782_v44, 0.0  ;;  %v775_v49 = vadd.f32 %v999_v23, %v726_v45  ;;  %v950_v50 = vadd.f32 %v949_v46, %v948_v41 }
 0x1f6   :  { %790 = vst [vmem:[#allocation8 + $0x8] sm:$0xff] %v786_v48  ;;  %v783_v51 = vadd.f32 %v775_v49, %v1228_v43  ;;  %v729_v52 = vadd.f32 %v950_v50, %v848_v42 }
 0x1f8   :  { %v787_v30 = vmax.f32 %v783_v51, 0.0  ;;  %v778_v54 = vadd.f32 %v1000_v28, %v729_v52 }
 0x1fa   :  { %791 = vst [vmem:[#allocation8 + $0x10] sm:$0xff] %v787_v30  ;;  %v784_v55 = vadd.f32 %v778_v54, %v1206_v32 }
 0x1fc   :  { %v788_v56 = vmax.f32 %v784_v55, 0.0 }
 0x1fe   :  { %792 = vst [vmem:[#allocation8 + $0x18] sm:$0xff] %v788_v56 }
 0x1ff   :  { %1129 = shalt.err (!%p1126_p5)
}
 0x200   :  { %804 = dma.vmem_to_hbm [thread:$0]  %s799_s9, 512, %s1324_s4, [#allocation4], %s1148_s25, %s1148_s25, %s1149_s26  }
 0x201   :  { %1142 = dma.done.wait [#allocation4], 512  }
 0x202   :  { %1143 = vsyncadd [#allocation4], 4294966784 }
 0x203   :  { %808 = vsyncpa [#allocation3], 1 }
 0x204   :  { %809 = vsyncpa [#allocation6], 1 }
 0x205   :  { %810 = vsyncpa [#allocation4], 1 }

// kernel: tpu_custom_call.1
= control target key start
LH: loop header
LB: loop body
LE: loop exit
PB: predicated region body
PF: predicated region fallthrough
CT: control target
= control target key end

     0   :  { %9 = vsyncpa [#allocation3], 0  ;;  %s1320_s0 = inlined_call_operand.hbm [shape: f32[32,128], index: 0, kind: input, shape index: {}]   ;;  %s1321_s1 = inlined_call_operand.hbm [shape: bf16[384,128], index: 1, kind: input, shape index: {}]   ;;  %s1322_s2 = inlined_call_operand.hbm [shape: bf16[384,128], index: 2, kind: input, shape index: {}]   ;;  %s1323_s3 = inlined_call_operand.vmem [shape: f32[2,128], index: 3, kind: input, shape index: {}]   ;;  %s1324_s4 = inlined_call_operand.hbm [shape: f32[32,128], index: 4, kind: output, shape index: {}]  }
   0x1   :  { %10 = vsyncpa [#allocation6], 0 }
   0x2   :  { %11 = vsyncpa [#allocation4], 0  ;;  %s1144_s15 = smov [#allocation5]  }
   0x3   :  { %s29_s16 = sshll.u32 %s1144_s15, 4  ;;  %s30_s16 = int_to_ptr.vmem [resolvable:$true] %s29_s16 }
   0x4   :  { %s1066_s17 = scalar_lea.vmem %s30_s16, 3072  ;;  %p1071_p1 = scmp.lt.s32.totalorder %s30_s16, %s30_s16 }
   0x5   :  { %p1067_p0 = scmp.ne.s32.totalorder %s30_s16, %s1066_s17  ;;  %p1072_p2 = scmp.lt.s32.totalorder %s1066_s17, %s1066_s17 }
   0x7   :  { %p1073_p3 = por %p1072_p2, %p1071_p1 }
   0x9   :  { %p1074_p4 = pnand %p1073_p3, %p1067_p0 }
   0xb   :  { %1077 = shalt.err (!%p1074_p4)
}
   0xc   :  { %s1145_s18 = smov 64   ;;  %s1146_s19 = smov 4  }
   0xd   :  { %35 = dma.hbm_to_vmem [thread:$0]  %s1321_s1, 3072, %s30_s16, [#allocation6], %s1145_s18, %s1145_s18, %s1146_s19  }
   0xe   :  { %s1147_s22 = smov [#allocation2]  }
   0xf   :  { %s17_s23 = sshll.u32 %s1147_s22, 4  ;;  %s18_s23 = int_to_ptr.vmem [resolvable:$true] %s17_s23 }
  0x10   :  { %s1086_s24 = scalar_lea.vmem %s18_s23, 512  ;;  %p1091_p6 = scmp.lt.s32.totalorder %s18_s23, %s18_s23 }
  0x11   :  { %p1087_p5 = scmp.ne.s32.totalorder %s18_s23, %s1086_s24  ;;  %p1092_p7 = scmp.lt.s32.totalorder %s1086_s24, %s1086_s24 }
  0x13   :  { %p1093_p8 = por %p1092_p7, %p1091_p6 }
  0x15   :  { %p1094_p9 = pnand %p1093_p8, %p1087_p5 }
  0x17   :  { %1097 = shalt.err (!%p1094_p9)
}
  0x18   :  { %s1148_s25 = smov 128   ;;  %s1149_s26 = smov 8  }
  0x19   :  { %23 = dma.hbm_to_vmem [thread:$0]  %s1320_s0, 512, %s18_s23, [#allocation3], %s1148_s25, %s1148_s25, %s1149_s26  }
  0x1a   :  { %s1150_s1 = smov [#allocation7]  }
  0x1b   :  { %s41_s29 = sshll.u32 %s1150_s1, 4  ;;  %s42_s29 = int_to_ptr.vmem [resolvable:$true] %s41_s29 }
  0x1c   :  { %s1106_s30 = scalar_lea.vmem %s42_s29, 3072  ;;  %p1111_p11 = scmp.lt.s32.totalorder %s42_s29, %s42_s29 }
  0x1d   :  { %p1107_p10 = scmp.ne.s32.totalorder %s42_s29, %s1106_s30  ;;  %p1112_p12 = scmp.lt.s32.totalorder %s1106_s30, %s1106_s30 }
  0x1f   :  { %p1113_p13 = por %p1112_p12, %p1111_p11 }
  0x21   :  { %p1114_p0 = pnand %p1113_p13, %p1107_p10 }
  0x23   :  { %1117 = shalt.err (!%p1114_p0)
}
  0x24   :  { %47 = dma.hbm_to_vmem [thread:$0]  %s1322_s2, 3072, %s42_s29, [#allocation6], %s1145_s18, %s1145_s18, %s1146_s19  }
  0x25   :  { %1138 = dma.done.wait [#allocation3], 512  }
  0x26   :  { %1139 = vsyncadd [#allocation3], 4294966784 }
  0x27   :  { %1140 = dma.done.wait [#allocation6], 6144  }
  0x28   :  { %1141 = vsyncadd [#allocation6], 4294961152  ;;  %v1010_v0 = vld [vmem:[#allocation5 + $0x78] sm:$0xff]   ;;  %v1012_v2 = vld [vmem:[#allocation5 + $0x70] sm:$0xff]   ;;  %v64_v7 = vlaneseq  ;;  %vm1151_vm5 = vmmov 1  }
  0x29   :  { %v1011_v1 = vld [vmem:[#allocation5 + $0x38] sm:$0xff]   ;;  %885 = vmatprep.subr.bf16.mxu0 %v1010_v0  ;;  %v1014_v4 = vld [vmem:[#allocation5 + $0x30] sm:$0xff]   ;;  %v1015_v5 = vld [vmem:[#allocation5 + $0x68] sm:$0xff]  }
  0x2a   :  { %886 = vmatpush3.bf16.msra.mxu0 %v1011_v1  ;;  %v1013_v3 = vld [vmem:[#allocation5 + $0xb8] sm:$0xff]   ;;  %v1016_v6 = vld [vmem:[#allocation5 + $0xb0] sm:$0xff]   ;;  %v1017_v8 = vld [vmem:[#allocation5 + $0x28] sm:$0xff]   ;;  %v1190_v12 = vshrl.u32 %v64_v7, 7 }
  0x2b   :  { %887 = vmatprep.subr.bf16.mxu0 %v1012_v2  ;;  %961 = vmatprep.subr.bf16.mxu1 %v1013_v3  ;;  %v1018_v9 = vld [vmem:[#allocation5 + $0x60] sm:$0xff]   ;;  %v1019_v10 = vld [vmem:[#allocation5 + $0xa8] sm:$0xff]   ;;  %v1021_v13 = vld [vmem:[#allocation5 + $0x58] sm:$0xff]  }
  0x2c   :  { %962 = vmatpush3.bf16.msra.mxu1 %v1013_v3  ;;  %v1020_v11 = vld [vmem:[#allocation5 + $0x20] sm:$0xff]   ;;  %v1023_v15 = vld [vmem:[#allocation5 + $0x18] sm:$0xff]   ;;  %v66_v16 = vadd.s32 8, %v1190_v12  ;;  %v68_v18 = vadd.s32 24, %v1190_v12  ;;  %v1024_v19 = vld [vmem:[#allocation5 + $0x50] sm:$0xff]   ;;  %v73_v20 = vand.u32 15, %v1190_v12 }
  0x2d   :  { %963 = vmatprep.subr.bf16.mxu1 %v1016_v6  ;;  %v1022_v14 = vld [vmem:[#allocation5 + $0xa0] sm:$0xff]   ;;  %v1025_v17 = vld [vmem:[#allocation5 + $0x98] sm:$0xff]   ;;  %v67_v21 = vadd.s32 16, %v1190_v12  ;;  %v1026_v22 = vld [vmem:[#allocation5 + $0x10] sm:$0xff]   ;;  %vm129_vm0 = vcmp.lt.s32.totalorder %v1190_v12, 1  ;;  %vm142_vm1 = vcmp.lt.s32.totalorder %v1190_v12, 7 }
  0x2e   :  { %888 = vmatpush3.bf16.msra.mxu0 %v1014_v4  ;;  %v80_v23 = vand.u32 15, %v66_v16  ;;  %v1028_v24 = vld [vmem:[#allocation5 + $0x90] sm:$0xff]   ;;  %v94_v25 = vand.u32 15, %v68_v18  ;;  %v1027_v26 = vld [vmem:[#allocation5 + $0x48] sm:$0xff]   ;;  %vm1198_vm2 = vcmp.ne.s32.totalorder %v73_v20, 0  ;;  %v1202_v30 = vld [vmem:[#allocation2] sm:$0xff] }
  0x2f   :  { %889 = vmatprep.subr.bf16.mxu0 %v1015_v5  ;;  %v1029_v27 = vld [vmem:[#allocation5 + $0x8] sm:$0xff]   ;;  %v1206_v32 = vld [vmem:[#allocation2 + $0x18] sm:$0xff]  ;;  %v87_v35 = vand.u32 15, %v67_v21  ;;  %v1030_v36 = vld [vmem:[#allocation5 + $0x40] sm:$0xff]   ;;  %v125_v37 = vrot.slane %v1202_v30, 7  ;;  %v138_v44 = vrot.slane %v1202_v30, 1 }
  0x30   :  { %964 = vmatpush3.bf16.msra.mxu1 %v1016_v6  ;;  %v1031_v28 = vld [vmem:[#allocation5 + $0x88] sm:$0xff]   ;;  %vm1208_vm3 = vcmp.ne.s32.totalorder %v80_v23, 15  ;;  %vm1212_vm4 = vcmp.ne.s32.totalorder %v94_v25, 15  ;;  %v128_v40 = vrot.slane %v1206_v32, 7  ;;  %v1032_v41 = vld [vmem:[#allocation5] sm:$0xff]   ;;  %vm1224_vm6 = vmpackc.low %vm1151_vm5, %vm1198_vm2  ;;  %v141_v48 = vrot.slane %v1206_v32, 1 }
  0x31   :  { %965 = vmatprep.subr.bf16.mxu1 %v1019_v10  ;;  %v1204_v31 = vld [vmem:[#allocation2 + $0x8] sm:$0xff]  ;;  %v1228_v43 = vld [vmem:[#allocation2 + $0x10] sm:$0xff]  ;;  %vm1236_vm7 = vmpackc.low %vm1208_vm3, %vm1151_vm5  ;;  %vm119_vm9 = vcmp.ne.s32.totalorder %v87_v35, 0 }
  0x32   :  { %890 = vmatpush3.bf16.msra.mxu0 %v1017_v8  ;;  %v126_v38 = vrot.slane %v1204_v31, 7  ;;  %v152_v39 = vpack.c.bf16 %v1204_v31, %v1202_v30  ;;  %v139_v45 = vrot.slane %v1204_v31, 1  ;;  %v140_v46 = vrot.slane %v1228_v43, 1  ;;  %v1033_v51 = vld [vmem:[#allocation5 + $0x80] sm:$0xff]   ;;  %vm1250_vm8 = vmpackc.low %vm1212_vm4, %vm1151_vm5  ;;  %v1034_v55 = vld [vmem:[#allocation7 + $0x78] sm:$0xff]  }
  0x33   :  { %891 = vmatprep.subr.bf16.mxu0 %v1018_v9  ;;  %v133_v50 = vsel %vm129_vm0, %v128_v40, %v125_v37  ;;  %v127_v57 = vrot.slane %v1228_v43, 7  ;;  %v1035_v58 = vld [vmem:[#allocation7 + $0xb8] sm:$0xff]   ;;  %v146_v61 = vsel %vm142_vm1, %v141_v48, %v138_v44  ;;  %v155_v63 = vpack.c.bf16 %v1206_v32, %v1228_v43  ;;  %vm1264_vm10 = vmpackc.low %vm1151_vm5, %vm119_vm9  ;;  %v1037_v5 = vld [vmem:[#allocation7 + $0x70] sm:$0xff]  }
  0x34   :  { %966 = vmatpush3.bf16.msra.mxu1 %v1019_v10  ;;  %386 = vmatprep.mubr.bf16.mxu0 %v152_v39  ;;  %v132_v49 = vsel %vm129_vm0, %v125_v37, %v126_v38  ;;  %v145_v52 = vsel %vm142_vm1, %v138_v44, %v139_v45  ;;  %v144_v54 = vsel %vm142_vm1, %v139_v45, %v140_v46  ;;  %v1036_v62 = vld [vmem:[#allocation7 + $0x38] sm:$0xff]   ;;  %v1038_v6 = vld [vmem:[#allocation7 + $0xb0] sm:$0xff]   ;;  %v1040_v8 = vld [vmem:[#allocation7 + $0x68] sm:$0xff]  }
  0x35   :  { %967 = vmatprep.subr.bf16.mxu1 %v1022_v14  ;;  %v843_v56 = vpack.c.bf16 %v144_v54, %v145_v52  ;;  %v837_v59 = vpack.c.bf16 %v132_v49, %v133_v50  ;;  %v143_v60 = vsel %vm142_vm1, %v140_v46, %v141_v48  ;;  %v130_v2 = vsel %vm129_vm0, %v127_v57, %v128_v40  ;;  %v1039_v7 = vld [vmem:[#allocation7 + $0x30] sm:$0xff]   ;;  %v1041_v9 = vld [vmem:[#allocation7 + $0xa8] sm:$0xff]   ;;  %v1047_v16 = vld [vmem:[#allocation7 + $0x98] sm:$0xff]  }
  0x36   :  { %892 = vmatpush3.bf16.msra.mxu0 %v1020_v11  ;;  %v846_v1 = vpack.c.bf16 %v146_v61, %v143_v60  ;;  %v131_v3 = vsel %vm129_vm0, %v126_v38, %v127_v57  ;;  %v1042_v10 = vld [vmem:[#allocation7 + $0x28] sm:$0xff]   ;;  %v1043_v11 = vld [vmem:[#allocation7 + $0x60] sm:$0xff]   ;;  %v1049_v18 = vld [vmem:[#allocation7 + $0x50] sm:$0xff]  }
  0x37   :  { %893 = vmatprep.subr.bf16.mxu0 %v1021_v13  ;;  %977 = vmatprep.mubr.msk.bf16.mxu1 %vm1236_vm7, %v843_v56  ;;  %v840_v4 = vpack.c.bf16 %v130_v2, %v131_v3  ;;  %v1044_v13 = vld [vmem:[#allocation7 + $0xa0] sm:$0xff]   ;;  %v1051_v20 = vld [vmem:[#allocation7 + $0x10] sm:$0xff]   ;;  %v1052_v21 = vld [vmem:[#allocation7 + $0x48] sm:$0xff]  }
  0x38   :  { %968 = vmatpush3.bf16.msra.mxu1 %v1022_v14  ;;  %v1045_v14 = vld [vmem:[#allocation7 + $0x20] sm:$0xff]   ;;  %v1054_v23 = vld [vmem:[#allocation7 + $0x8] sm:$0xff]  }
  0x39   :  { %969 = vmatprep.subr.bf16.mxu1 %v1025_v17  ;;  %v1056_v25 = vld [vmem:[#allocation7 + $0x80] sm:$0xff]  }
  0x3a   :  { %894 = vmatpush3.bf16.msra.mxu0 %v1023_v15  ;;  %v1046_v15 = vld [vmem:[#allocation7 + $0x58] sm:$0xff]   ;;  %v811_v34 = vld [vmem:[%s1323_s3] ss:$0 sm:$0xff]  ;;  %v848_v42 = vld [vmem:[%s1323_s3 + $0x1] ss:$0 sm:$0xff]  ;;  %s1152_s3 = smov [#allocation8]  }
  0x3b   :  { %895 = vmatprep.subr.bf16.mxu0 %v1024_v19  ;;  %v1050_v19 = vld [vmem:[#allocation7 + $0x90] sm:$0xff]   ;;  %s798_s9 = sshll.u32 %s1152_s3, 4  ;;  %s799_s9 = int_to_ptr.vmem [resolvable:$true] %s798_s9 }
  0x3c   :  { %970 = vmatpush3.bf16.msra.mxu1 %v1025_v17  ;;  %v1048_v17 = vld [vmem:[#allocation7 + $0x18] sm:$0xff]   ;;  %s1118_s10 = scalar_lea.vmem %s799_s9, 512  ;;  %p1123_p2 = scmp.lt.s32.totalorder %s799_s9, %s799_s9 }
  0x3d   :  { %971 = vmatprep.subr.bf16.mxu1 %v1028_v24  ;;  %p1119_p1 = scmp.ne.s32.totalorder %s799_s9, %s1118_s10  ;;  %p1124_p3 = scmp.lt.s32.totalorder %s1118_s10, %s1118_s10 }
  0x3e   :  { %896 = vmatpush3.bf16.msra.mxu0 %v1026_v22  ;;  %v1053_v22 = vld [vmem:[#allocation7 + $0x88] sm:$0xff]  }
  0x3f   :  { %897 = vmatprep.subr.bf16.mxu0 %v1027_v26  ;;  %v1057_v26 = vld [vmem:[#allocation7] sm:$0xff]   ;;  %p1125_p4 = por %p1124_p3, %p1123_p2 }
  0x40   :  { %972 = vmatpush3.bf16.msra.mxu1 %v1028_v24  ;;  %v1055_v24 = vld [vmem:[#allocation7 + $0x40] sm:$0xff]  }
  0x41   :  { %973 = vmatprep.subr.bf16.mxu1 %v1031_v28  ;;  %p1126_p5 = pnand %p1125_p4, %p1119_p1 }
  0x42   :  { %898 = vmatpush3.bf16.msra.mxu0 %v1029_v27 }
  0x43   :  { %899 = vmatprep.subr.bf16.mxu0 %v1030_v36 }
  0x44   :  { %974 = vmatpush3.bf16.msra.mxu1 %v1031_v28 }
  0x45   :  { %975 = vmatprep.subr.bf16.mxu1 %v1033_v51 }
  0x46   :  { %900 = vmatpush3.bf16.msra.mxu0 %v1032_v41 }
  0x47   :  { %923 = vmatprep.subr.bf16.mxu0 %v1034_v55 }
  0x48   :  { %976 = vmatpush3.bf16.msra.mxu1 %v1033_v51 }
  0x49   :  { %838 = vmatmul.mubr.msk.bf16.vlgmr.msra.gmra.mxu0 %vm1224_vm6, %v837_v59  ;;  %981 = vmatprep.subr.bf16.mxu1 %v1035_v58 }
  0x4a   :  { %394 = vmatprep.mubr.bf16.mxu0 %v155_v63  ;;  %924 = vmatpush3.bf16.msra.mxu0 %v1036_v62 }
  0x4b   :  { %978 = vmatmul.mubr.msk.bf16.vlgmr.msra.gmra.mxu1 %vm1250_vm8, %v846_v1  ;;  %925 = vmatprep.subr.bf16.mxu0 %v1037_v5 }
  0x4c   :  { %982 = vmatpush3.bf16.msra.mxu1 %v1035_v58 }
  0x4d   :  { %983 = vmatprep.subr.bf16.mxu1 %v1038_v6 }
  0x4e   :  { %926 = vmatpush3.bf16.msra.mxu0 %v1039_v7 }
  0x4f   :  { %927 = vmatprep.subr.bf16.mxu0 %v1040_v8 }
  0x50   :  { %984 = vmatpush3.bf16.msra.mxu1 %v1038_v6 }
  0x51   :  { %841 = vmatmul.mubr.msk.bf16.gmra.mxu0 %vm1264_vm10, %v840_v4  ;;  %985 = vmatprep.subr.bf16.mxu1 %v1041_v9 }
  0x52   :  { %928 = vmatpush3.bf16.msra.mxu0 %v1042_v10 }
  0x53   :  { %929 = vmatprep.subr.bf16.mxu0 %v1043_v11 }
  0x54   :  { %986 = vmatpush3.bf16.msra.mxu1 %v1041_v9 }
  0x55   :  { %987 = vmatprep.subr.bf16.mxu1 %v1044_v13 }
  0x56   :  { %930 = vmatpush3.bf16.msra.mxu0 %v1045_v14 }
  0x57   :  { %931 = vmatprep.subr.bf16.mxu0 %v1046_v15 }
  0x58   :  { %988 = vmatpush3.bf16.msra.mxu1 %v1044_v13 }
  0x59   :  { %989 = vmatprep.subr.bf16.mxu1 %v1047_v16 }
  0x5a   :  { %932 = vmatpush3.bf16.msra.mxu0 %v1048_v17 }
  0x5b   :  { %933 = vmatprep.subr.bf16.mxu0 %v1049_v18 }
  0x5c   :  { %990 = vmatpush3.bf16.msra.mxu1 %v1047_v16 }
  0x5d   :  { %991 = vmatprep.subr.bf16.mxu1 %v1050_v19 }
  0x5e   :  { %934 = vmatpush3.bf16.msra.mxu0 %v1051_v20 }
  0x5f   :  { %935 = vmatprep.subr.bf16.mxu0 %v1052_v21 }
  0x60   :  { %992 = vmatpush3.bf16.msra.mxu1 %v1050_v19 }
  0x61   :  { %993 = vmatprep.subr.bf16.mxu1 %v1053_v22 }
  0x62   :  { %936 = vmatpush3.bf16.msra.mxu0 %v1054_v23 }
  0x63   :  { %937 = vmatprep.subr.bf16.mxu0 %v1055_v24 }
  0x64   :  { %994 = vmatpush3.bf16.msra.mxu1 %v1053_v22 }
  0x65   :  { %995 = vmatprep.subr.bf16.mxu1 %v1056_v25 }
  0x66   :  { %938 = vmatpush3.bf16.msra.mxu0 %v1057_v26 }
  0x68   :  { %996 = vmatpush3.bf16.msra.mxu1 %v1056_v25 }
 0x109   :  { %v901_v27 = vpop.f32.mrf.mxu0 }
 0x10b   :  { %v902_v28 = vpop.f32.mrf.mxu0  ;;  %v979_v33 = vpop.f32.mrf.mxu1 }
 0x10c   :  { %v903_v29 = vadd.f32 %v902_v28, %v901_v27 }
 0x10d   :  { %v904_v35 = vpop.f32.mrf.mxu0  ;;  %v437_v36 = vpop.f32.mrf.mxu1 }
 0x10e   :  { %v389_v38 = vadd.f32 %v903_v29, %v811_v34 }
 0x10f   :  { %v905_v37 = vpop.f32.mrf.mxu0  ;;  %v980_v40 = vpop.f32.mrf.mxu1 }
 0x110   :  { %v906_v39 = vadd.f32 %v905_v37, %v904_v35  ;;  %v438_v46 = vadd.f32 %v437_v36, %v389_v38 }
 0x111   :  { %v907_v41 = vpop.f32.mrf.mxu0  ;;  %v440_v45 = vpop.f32.mrf.mxu1 }
 0x112   :  { %v392_v44 = vadd.f32 %v906_v39, %v811_v34  ;;  %v452_v55 = vmax.f32 %v438_v46, 0.0 }
 0x113   :  { %v908_v48 = vpop.f32.mrf.mxu0 }
 0x114   :  { %v909_v49 = vadd.f32 %v908_v48, %v907_v41  ;;  %v441_v50 = vadd.f32 %v440_v45, %v392_v44  ;;  %v468_v63 = vrot.slane %v452_v55, 1  ;;  %v456_v8 = vrot.slane %v452_v55, 7 }
 0x115   :  { %v910_v51 = vpop.f32.mrf.mxu0 }
 0x116   :  { %v397_v52 = vadd.f32 %v909_v49, %v811_v34  ;;  %v453_v54 = vmax.f32 %v441_v50, 0.0 }
 0x117   :  { %v911_v56 = vpop.f32.mrf.mxu0 }
 0x118   :  { %v446_v57 = vadd.f32 %v979_v33, %v397_v52  ;;  %v912_v58 = vadd.f32 %v911_v56, %v910_v51  ;;  %v481_v59 = vpack.c.bf16 %v453_v54, %v452_v55  ;;  %v469_v61 = vrot.slane %v453_v54, 1 }
 0x119   :  { %v457_v3 = vrot.slane %v453_v54, 7 }
 0x11a   :  { %v454_v60 = vmax.f32 %v446_v57, 0.0  ;;  %v400_v62 = vadd.f32 %v912_v58, %v811_v34  ;;  %715 = vmatprep.mubr.bf16.mxu0 %v481_v59  ;;  %v474_v6 = vsel %vm142_vm1, %v468_v63, %v469_v61 }
 0x11b   :  { %v462_v11 = vsel %vm129_vm0, %v456_v8, %v457_v3 }
 0x11c   :  { %v470_v1 = vrot.slane %v454_v60, 1  ;;  %v449_v2 = vadd.f32 %v980_v40, %v400_v62  ;;  %v458_v47 = vrot.slane %v454_v60, 7 }
 0x11e   :  { %v455_v4 = vmax.f32 %v449_v2, 0.0  ;;  %v473_v5 = vsel %vm142_vm1, %v469_v61, %v470_v1  ;;  %v461_v20 = vsel %vm129_vm0, %v457_v3, %v458_v47 }
 0x11f   :  { %v880_v7 = vpack.c.bf16 %v473_v5, %v474_v6 }
 0x120   :  { %v459_v9 = vrot.slane %v455_v4, 7  ;;  %v471_v10 = vrot.slane %v455_v4, 1  ;;  %v484_v18 = vpack.c.bf16 %v455_v4, %v454_v60 }
 0x121   :  { %997 = vmatprep.mubr.msk.bf16.mxu1 %vm1236_vm7, %v880_v7 }
 0x122   :  { %v463_v13 = vsel %vm129_vm0, %v459_v9, %v456_v8  ;;  %v472_v14 = vsel %vm142_vm1, %v470_v1, %v471_v10  ;;  %v475_v15 = vsel %vm142_vm1, %v471_v10, %v468_v63  ;;  %v460_v19 = vsel %vm129_vm0, %v458_v47, %v459_v9 }
 0x123   :  { %v874_v16 = vpack.c.bf16 %v462_v11, %v463_v13  ;;  %v883_v17 = vpack.c.bf16 %v475_v15, %v472_v14  ;;  %v877_v21 = vpack.c.bf16 %v460_v19, %v461_v20 }
 0x125   :  { %875 = vmatmul.mubr.msk.bf16.vlgmr.msra.gmra.mxu0 %vm1224_vm6, %v874_v16  ;;  %998 = vmatmul.mubr.msk.bf16.vlgmr.msra.gmra.mxu1 %vm1250_vm8, %v883_v17 }
 0x126   :  { %723 = vmatprep.mubr.bf16.mxu0 %v484_v18 }
 0x12d   :  { %878 = vmatmul.mubr.msk.bf16.gmra.mxu0 %vm1264_vm10, %v877_v21 }
 0x1e5   :  { %v939_v22 = vpop.f32.mrf.mxu0  ;;  %v999_v23 = vpop.f32.mrf.mxu1 }
 0x1e7   :  { %v940_v24 = vpop.f32.mrf.mxu0  ;;  %v766_v53 = vpop.f32.mrf.mxu1 }
 0x1e8   :  { %v941_v25 = vadd.f32 %v940_v24, %v939_v22 }
 0x1e9   :  { %v942_v26 = vpop.f32.mrf.mxu0  ;;  %v1000_v28 = vpop.f32.mrf.mxu1 }
 0x1ea   :  { %v718_v27 = vadd.f32 %v941_v25, %v848_v42 }
 0x1eb   :  { %v943_v29 = vpop.f32.mrf.mxu0  ;;  %v769_v36 = vpop.f32.mrf.mxu1 }
 0x1ec   :  { %v767_v33 = vadd.f32 %v766_v53, %v718_v27  ;;  %v944_v12 = vadd.f32 %v943_v29, %v942_v26 }
 0x1ed   :  { %v945_v34 = vpop.f32.mrf.mxu0 }
 0x1ee   :  { %v781_v35 = vadd.f32 %v767_v33, %v1202_v30  ;;  %v721_v0 = vadd.f32 %v944_v12, %v848_v42 }
 0x1ef   :  { %v946_v37 = vpop.f32.mrf.mxu0 }
 0x1f0   :  { %v785_v38 = vmax.f32 %v781_v35, 0.0  ;;  %v770_v39 = vadd.f32 %v769_v36, %v721_v0  ;;  %v947_v40 = vadd.f32 %v946_v37, %v945_v34 }
 0x1f1   :  { %v948_v41 = vpop.f32.mrf.mxu0 }
 0x1f2   :  { %789 = vst [vmem:[#allocation8] sm:$0xff] %v785_v38  ;;  %v782_v44 = vadd.f32 %v770_v39, %v1204_v31  ;;  %v726_v45 = vadd.f32 %v947_v40, %v848_v42 }
 0x1f3   :  { %v949_v46 = vpop.f32.mrf.mxu0 }
 0x1f4   :  { %v786_v48 = vmax.f32 %v782_v44, 0.0  ;;  %v775_v49 = vadd.f32 %v999_v23, %v726_v45  ;;  %v950_v50 = vadd.f32 %v949_v46, %v948_v41 }
 0x1f6   :  { %790 = vst [vmem:[#allocation8 + $0x8] sm:$0xff] %v786_v48  ;;  %v783_v51 = vadd.f32 %v775_v49, %v1228_v43  ;;  %v729_v52 = vadd.f32 %v950_v50, %v848_v42 }
 0x1f8   :  { %v787_v30 = vmax.f32 %v783_v51, 0.0  ;;  %v778_v54 = vadd.f32 %v1000_v28, %v729_v52 }
 0x1fa   :  { %791 = vst [vmem:[#allocation8 + $0x10] sm:$0xff] %v787_v30  ;;  %v784_v55 = vadd.f32 %v778_v54, %v1206_v32 }
 0x1fc   :  { %v788_v56 = vmax.f32 %v784_v55, 0.0 }
 0x1fe   :  { %792 = vst [vmem:[#allocation8 + $0x18] sm:$0xff] %v788_v56 }
 0x1ff   :  { %1129 = shalt.err (!%p1126_p5)
}
 0x200   :  { %804 = dma.vmem_to_hbm [thread:$0]  %s799_s9, 512, %s1324_s4, [#allocation4], %s1148_s25, %s1148_s25, %s1149_s26  }
 0x201   :  { %1142 = dma.done.wait [#allocation4], 512  }
 0x202   :  { %1143 = vsyncadd [#allocation4], 4294966784 }
 0x203   :  { %808 = vsyncpa [#allocation3], 1 }
 0x204   :  { %809 = vsyncpa [#allocation6], 1 }
 0x205   :  { %810 = vsyncpa [#allocation4], 1 }

</bundles_post_ra>
